<compile_context>
chip_gen: v7x
topology: tpu7x:2x2x1
jax: 0.10.0
libtpu: 0.0.40
codegen_flags: <defaults>
</compile_context>

<pallas_src>
import functools
import math

import jax
import jax.numpy as jnp
from jax.experimental import pallas as pl
from jax.experimental.pallas import tpu as pltpu


def _round_up(x, m):
    return (x + m - 1) // m * m


def _cdiv(a, b):
    return (a + b - 1) // b


def _qlinear_kernel(x_ref, w_ref, sb_ref, o_ref, acc_ref):
    """One (tm, tn) output tile, accumulating over the K grid axis.

    x_ref:   (tm, tk)  bf16 activations
    w_ref:   (tk, tn)  int8 quantized weights (pre-transposed, K-major)
    sb_ref:  (2,  tn)  bf16 [scale; bias] rows (lane-dense)
    o_ref:   (tm, tn)  bf16 output
    acc_ref: (tm, tn)  f32 accumulator scratch
    """
    k = pl.program_id(2)

    @pl.when(k == 0)
    def _():
        acc_ref[...] = jnp.zeros_like(acc_ref)

    # Per-channel scale is deferred to the epilogue; the K loop only casts the
    # int8 tile and feeds the MXU with a plain (tm,tk)x(tk,tn) contraction
    # (no transposed operand -> no XLU transpose / extra VMEM copy).
    # TODO(synk): on v5e/v6e, try feeding the int8 tile straight to the MXU
    # (mixed bf16 x s8, or s8 x s8 with activation quantization); the portable
    # bf16-cast path is kept because the v7x MXU has no integer support.
    w_bf = w_ref[...].astype(x_ref.dtype)                        # (tk, tn)
    acc_ref[...] += jnp.dot(x_ref[...], w_bf,
                            preferred_element_type=jnp.float32)

    @pl.when(k == pl.num_programs(2) - 1)
    def _():
        sb = sb_ref[...].astype(jnp.float32)                     # (2, tn)
        scale = sb[0:1, :]                                       # (1, tn)
        bias = sb[1:2, :]                                        # (1, tn)
        o_ref[...] = (acc_ref[...] * scale + bias).astype(o_ref.dtype)


def prepare_quantized_linear(weight_f32, bias):
    """Quantize like QuantizedLinear.__init__ (weight_bit_width=8) and prepare
    the static kernel operands once, outside the per-call hot path.

    Returns:
      qweight    (N, K)  int8   -- reference-layout quantized weight
      scale      (N,)    bf16   -- per-output-channel scale (zero-guarded)
      qweight_t  (Kp, Np) int8  -- pre-transposed, zero-padded kernel weight
      scale_bias (2, Np) bf16   -- fused [scale; bias], zero-padded
    """
    N, K = weight_f32.shape
    scale = (jnp.max(jnp.abs(weight_f32), axis=-1) / 127.0).astype(jnp.bfloat16)
    safe_scale = jnp.where(scale == 0, jnp.ones_like(scale), scale)
    q = jnp.round(weight_f32 / safe_scale[:, None].astype(jnp.float32))
    # Clamp guards bf16-rounded-scale overflow (module would allow -128).
    qweight = jnp.clip(q, -127, 127).astype(jnp.int8)            # (N, K)

    Np = _round_up(N, 128)
    Kp = _round_up(K, 128)
    # (K, N) layout: plain MXU contraction; padded K rows are zero so they
    # contribute 0 to the accumulation; padded N cols are sliced/masked off.
    qweight_t = jnp.pad(qweight.T, ((0, Kp - K), (0, Np - N)))   # (Kp, Np)

    bias_bf = bias.astype(jnp.bfloat16)
    sb = jnp.stack([safe_scale, bias_bf], axis=0)                # (2, N)
    scale_bias = jnp.pad(sb, ((0, 0), (0, Np - N)))              # (2, Np)
    return qweight, safe_scale, qweight_t, scale_bias


@functools.partial(jax.jit, static_argnames=("out_features", "tm", "tn", "tk"))
def quantized_linear(x, qweight_t, scale_bias, *, out_features,
                     tm=512, tn=512, tk=2048):
    """x: (..., K) bf16; qweight_t: (Kp, Np) int8; scale_bias: (2, Np) bf16."""
    *lead, K = x.shape
    Kp, Np = qweight_t.shape
    N = out_features
    assert N <= Np and K <= Kp and Kp - K < 128, "weights not prepared for x"
    M = math.prod(lead) if lead else 1

    x2 = x.reshape(M, K)
    # K padding only when K is not already a 128-multiple (rare); the padded
    # weight rows are zero so the tail contributes 0 to the reduction.
    if Kp != K:
        x2 = jnp.pad(x2, ((0, 0), (0, Kp - K)))

    # Clamp tiles to the problem.  M/N raggedness is handled by cdiv grids +
    # masked partial-block stores (no pad-to-tile compute waste); K tiles must
    # divide Kp exactly so the reduction never sees out-of-bounds data.
    tm = min(tm, _round_up(M, 8))
    tn = min(tn, Np)
    tk = min(tk, Kp)
    while Kp % tk:          # Kp is a multiple of 128 -> terminates at >= 128
        tk -= 128

    grid_m = _cdiv(M, tm)
    grid_n = _cdiv(N, tn)
    # v7x has two TensorCores: for tiny problems make sure at least one
    # "parallel" axis has >= 2 blocks (harmless extra step on v5e/v6e).
    if grid_m == 1 and grid_n == 1 and Np >= 256:
        tn = max(128, (tn // 2) // 128 * 128)
        grid_n = _cdiv(N, tn)
    grid_k = Kp // tk

    # TODO(synk): if xprof shows exposed weight DMA at very small M (decode),
    # add pipeline_mode=pl.Buffered(3) on the weight BlockSpec.
    out = pl.pallas_call(
        _qlinear_kernel,
        out_shape=jax.ShapeDtypeStruct((M, N), x.dtype),
        grid_spec=pltpu.PrefetchScalarGridSpec(
            num_scalar_prefetch=0,
            grid=(grid_m, grid_n, grid_k),
            in_specs=[
                pl.BlockSpec((tm, tk), lambda i, j, k: (i, k)),   # x
                pl.BlockSpec((tk, tn), lambda i, j, k: (k, j)),   # qweight (K,N)
                pl.BlockSpec((2, tn), lambda i, j, k: (0, j)),    # scale+bias
            ],
            out_specs=pl.BlockSpec((tm, tn), lambda i, j, k: (i, j)),
            scratch_shapes=[pltpu.VMEM((tm, tn), jnp.float32)],
        ),
        compiler_params=pltpu.CompilerParams(
            dimension_semantics=("parallel", "parallel", "arbitrary"),
            vmem_limit_bytes=32 * 1024 * 1024),
    )(x2, qweight_t, scale_bias)

    return out.reshape(*lead, N)


if __name__ == "__main__":
    # Small shapes consistent with a transformer linear layer.
    batch, seq, in_features, out_features = 2, 8, 256, 256

    key = jax.random.PRNGKey(0)
    k_w, k_x, k_b = jax.random.split(key, 3)

    weight_f32 = jax.random.normal(k_w, (out_features, in_features),
                                   dtype=jnp.float32) * 0.02
    bias = (jax.random.normal(k_b, (out_features,), dtype=jnp.float32)
            * 0.02).astype(jnp.bfloat16)
    x = jax.random.normal(k_x, (batch, seq, in_features),
                          dtype=jnp.float32).astype(jnp.bfloat16)

    qweight, scale, qweight_t, scale_bias = prepare_quantized_linear(
        weight_f32, bias)

    out = quantized_linear(x, qweight_t, scale_bias, out_features=out_features)
    jax.block_until_ready(out)

    # Pure-JAX reference of the original module's dequant-matmul semantics.
    w_deq = qweight.astype(jnp.bfloat16) * scale[:, None]
    ref = (jnp.dot(x.reshape(-1, in_features), w_deq.T,
                   preferred_element_type=jnp.float32)
           .astype(jnp.bfloat16)
           .reshape(batch, seq, out_features) + bias)

    assert out.shape == (batch, seq, out_features)
    assert out.dtype == jnp.bfloat16
    # Deferred-scale f32 accumulation differs from the reference only at the
    # bf16 last-bit level (slightly more accurate); 1e-2 covers it.
    assert jnp.allclose(out.astype(jnp.float32), ref.astype(jnp.float32),
                        atol=1e-2, rtol=1e-2)

    print("KERNEL_OK")
</pallas_src>

<mosaic_0001>
module attributes {stable_mosaic.version = 11 : i64} {
  func.func @_qlinear_kernel(%arg0: i32, %arg1: i32, %arg2: i32, %arg3: memref<16x256xbf16, #tpu.memory_space<vmem>>, %arg4: memref<256x128xi8, #tpu.memory_space<vmem>>, %arg5: memref<2x128xbf16, #tpu.memory_space<vmem>>, %arg6: memref<16x128xbf16, #tpu.memory_space<vmem>>, %arg7: memref<16x128xf32, #tpu.memory_space<vmem>>) attributes {dimension_semantics = [#tpu.dimension_semantics<parallel>, #tpu.dimension_semantics<parallel>, #tpu.dimension_semantics<arbitrary>], iteration_bounds = array<i64: 1, 2, 1>, scalar_prefetch = 0 : i64, scratch_operands = 1 : i64, tpu.core_type = #tpu.core_type<tc>, window_params = [{transform_indices = @transform_0, window_bounds = array<i64: 16, 256>}, {transform_indices = @transform_1, window_bounds = array<i64: 256, 128>}, {transform_indices = @transform_2, window_bounds = array<i64: 2, 128>}, {transform_indices = @transform_3, window_bounds = array<i64: 16, 128>}]} {
    %c0_i32 = arith.constant 0 : i32
    %0 = arith.cmpi eq, %arg2, %c0_i32 : i32
    %1 = arith.extui %0 : i1 to i32
    %c0_i32_0 = arith.constant 0 : i32
    %2 = arith.cmpi ne, %1, %c0_i32_0 : i32
    scf.if %2 {
      %cst_10 = arith.constant 0.000000e+00 : f32
      %13 = vector.broadcast %cst_10 : f32 to vector<16x128xf32>
      %c0_11 = arith.constant 0 : index
      %c0_12 = arith.constant 0 : index
      %14 = vector.load %arg7[%c0_11, %c0_12] : memref<16x128xf32, #tpu.memory_space<vmem>>, vector<16x128xf32>
      tpu.vector_store %arg7[%c0_11, %c0_12], %13 {strides = array<i32>} : memref<16x128xf32, #tpu.memory_space<vmem>>, vector<16x128xf32>,
    } else {
    }
    %c0 = arith.constant 0 : index
    %c0_1 = arith.constant 0 : index
    %3 = vector.load %arg4[%c0, %c0_1] : memref<256x128xi8, #tpu.memory_space<vmem>>, vector<256x128xi8>
    %4 = arith.sitofp %3 : vector<256x128xi8> to vector<256x128xbf16>
    %c0_2 = arith.constant 0 : index
    %c0_3 = arith.constant 0 : index
    %5 = vector.load %arg7[%c0_2, %c0_3] : memref<16x128xf32, #tpu.memory_space<vmem>>, vector<16x128xf32>
    %c0_4 = arith.constant 0 : index
    %c0_5 = arith.constant 0 : index
    %6 = vector.load %arg3[%c0_4, %c0_5] : memref<16x256xbf16, #tpu.memory_space<vmem>>, vector<16x256xbf16>
    %cst = arith.constant dense<0.000000e+00> : vector<16x128xf32>
    %7 = tpu.matmul %6, %4, %cst {dimension_numbers = #tpu.dot_dimension_numbers<[1], [0], [0], [1], [0, 0, 1, 1], [], []>} : vector<16x256xbf16>, vector<256x128xbf16>, vector<16x128xf32> -> vector<16x128xf32>
    %8 = arith.addf %5, %7 : vector<16x128xf32>
    %c0_6 = arith.constant 0 : index
    %c0_7 = arith.constant 0 : index
    %9 = vector.load %arg7[%c0_6, %c0_7] : memref<16x128xf32, #tpu.memory_space<vmem>>, vector<16x128xf32>
    tpu.vector_store %arg7[%c0_6, %c0_7], %8 {strides = array<i32>} : memref<16x128xf32, #tpu.memory_space<vmem>>, vector<16x128xf32>,
    %c0_i32_8 = arith.constant 0 : i32
    %10 = arith.cmpi eq, %arg2, %c0_i32_8 : i32
    %11 = arith.extui %10 : i1 to i32
    %c0_i32_9 = arith.constant 0 : i32
    %12 = arith.cmpi ne, %11, %c0_i32_9 : i32
    scf.if %12 {
      %c0_10 = arith.constant 0 : index
      %c0_11 = arith.constant 0 : index
      %13 = vector.load %arg5[%c0_10, %c0_11] : memref<2x128xbf16, #tpu.memory_space<vmem>>, vector<2x128xbf16>
      %14 = arith.extf %13 : vector<2x128xbf16> to vector<2x128xf32>
      %15 = vector.extract_strided_slice %14 {offsets = [0, 0], sizes = [1, 128], strides = [1, 1]} : vector<2x128xf32> to vector<1x128xf32>
      %16 = vector.extract_strided_slice %14 {offsets = [1, 0], sizes = [1, 128], strides = [1, 1]} : vector<2x128xf32> to vector<1x128xf32>
      %c0_12 = arith.constant 0 : index
      %c0_13 = arith.constant 0 : index
      %17 = vector.load %arg7[%c0_12, %c0_13] : memref<16x128xf32, #tpu.memory_space<vmem>>, vector<16x128xf32>
      %18 = vector.broadcast %15 : vector<1x128xf32> to vector<16x128xf32>
      %19 = arith.mulf %17, %18 : vector<16x128xf32>
      %20 = vector.broadcast %16 : vector<1x128xf32> to vector<16x128xf32>
      %21 = arith.addf %19, %20 : vector<16x128xf32>
      %22 = arith.truncf %21 : vector<16x128xf32> to vector<16x128xbf16>
      %c0_14 = arith.constant 0 : index
      %c0_15 = arith.constant 0 : index
      %23 = vector.load %arg6[%c0_14, %c0_15] : memref<16x128xbf16, #tpu.memory_space<vmem>>, vector<16x128xbf16>
      tpu.vector_store %arg6[%c0_14, %c0_15], %22 {strides = array<i32>} : memref<16x128xbf16, #tpu.memory_space<vmem>>, vector<16x128xbf16>,
    } else {
    }
    return
  }
  func.func @transform_0(%arg0: i32, %arg1: i32, %arg2: i32) -> (i32, i32) {
    %c0_i32 = arith.constant 0 : i32
    return %arg0, %arg2 : i32, i32
  }
  func.func @transform_1(%arg0: i32, %arg1: i32, %arg2: i32) -> (i32, i32) {
    %c0_i32 = arith.constant 0 : i32
    return %arg2, %arg1 : i32, i32
  }
  func.func @transform_2(%arg0: i32, %arg1: i32, %arg2: i32) -> (i32, i32) {
    %c0_i32 = arith.constant 0 : i32
    %c0_i32_0 = arith.constant 0 : i32
    return %c0_i32, %arg1 : i32, i32
  }
  func.func @transform_3(%arg0: i32, %arg1: i32, %arg2: i32) -> (i32, i32) {
    %c0_i32 = arith.constant 0 : i32
    return %arg0, %arg1 : i32, i32
  }
}

</mosaic_0001>

<bundles_post_ra>
// kernel: quantized_linear.1
= control target key start
LH: loop header
LB: loop body
LE: loop exit
PB: predicated region body
PF: predicated region fallthrough
CT: control target
= control target key end

     0   :  { %8 = vsyncpa [#allocation4], 0  ;;  %s1055_s0 = inlined_call_operand.hbm [shape: bf16[16,256], index: 0, kind: input, shape index: {}]   ;;  %s1056_s1 = inlined_call_operand.hbm [shape: s8[256,256], index: 1, kind: input, shape index: {}]   ;;  %s1057_s2 = inlined_call_operand.vmem [shape: bf16[2,256], index: 2, kind: input, shape index: {}]   ;;  %s1058_s3 = inlined_call_operand.hbm [shape: bf16[16,256], index: 3, kind: output, shape index: {}]  }
   0x1   :  { %9 = vsyncpa [#allocation7], 0 }
   0x2   :  { %11 = vsyncpa [#allocation7 + $0x1], 0 }
   0x3   :  { %12 = vsyncpa [#allocation5], 0 }
   0x4   :  { %14 = vsyncpa [#allocation5 + $0x1], 0  ;;  %s814_s12 = smov 0   ;;  %s816_s13 = smov 0  }
   0x5   :  { %s818_s14 = smov 0   ;;  %s820_s15 = smov 0  }
   0x6   :  { %s822_s16 = smov 0   ;;  %s824_s17 = smov 0  }
   0x7 LB: > { %s509_s18 = sadd.s32 4294967295, %s783_s17   ;;  %s510_s19 = sadd.s32 4294967294, %s783_s17   ;;  %s783_s17 = sphi %s824_s17, %s20_s17   ;;  %s779_s16 = sphi %s822_s16, %s1086_s16   ;;  %s775_s15 = sphi %s820_s15, %s1085_s15   ;;  %s771_s14 = sphi %s818_s14, %s1084_s14   ;;  %s767_s13 = sphi %s816_s13, %s1083_s13   ;;  %s763_s12 = sphi %s814_s12, %s1082_s12  }
   0x8   : > { %p83_p0 = scmp.ne.s32.totalorder %s771_s14, %s767_s13  ;;  %p84_p1 = scmp.eq.s32.totalorder %s783_s17, 0 }
   0x9   : > { %p89_p2 = scmp.ne.s32.totalorder %s767_s13, %s763_s12  ;;  %p851_p3 = scmp.eq.s32.totalorder %s509_s18, 0 }
   0xa   : > { %p855_p4 = por %p84_p1, %p83_p0  ;;  %p141_p5 = scmp.eq.s32.totalorder %s509_s18, 1 }
   0xb   : > { %s1066_s20 = scalar_select %p851_p3, 1, 0 }
   0xc   : > { %p861_p6 = por %p851_p3, %p89_p2  ;;  %p147_p7 = scmp.eq.s32.totalorder %s510_s19, 1 }
   0xd   : > { %p865_p8 = por %p141_p5, %p83_p0  ;;  %p511_p9 = scmp.ge.s32.totalorder %s783_s17, 1 }
   0xe   : > { %s1068_s22 = scalar_select %p861_p6, 1, 0 }
   0xf   : > { %s1069_s23 = scalar_select %p865_p8, 1, 0 }
  0x10   : > { %p870_p10 = por %p147_p7, %p89_p2  ;;  %p154_p11 = scmp.lt.s32.totalorder %s783_s17, 3 }
  0x11   : > { %s785_s26 = smov [#allocation3]   ;;  %p578_p1 = scmp.lt.s32.totalorder %s783_s17, 2 }
  0x12   : > { %s1070_s24 = scalar_select %p870_p10, 1, 0 }
  0x13   : > { %p875_p12 = pnand %p511_p9, %p154_p11  ;;  %s172_s27 = sshll.u32 %s785_s26, 4  ;;  %s879_s27 = int_to_ptr.vmem [resolvable:$true] %s172_s27 }
  0x14   : > { %p893_p2 = pnand %p578_p1, %p855_p4  ;;  %s35_s30 = sadd.s32 1, %s779_s16 }
  0x15   : > { %s1071_s25 = scalar_select %p875_p12, 1, 0 }
  0x16   : > { %p565_p13 = pneg %p875_p12  ;;  %s639_s6 = scalar_lea.hbm %s1055_s0, 256 }
  0x17   : > { %s1073_s29 = scalar_select %p893_p2, 1, 0 }
  0x18   : > { %p887_p5 = pnand %p565_p13, %p851_p3  ;;  %p640_p7 = scmp.ne.s32.totalorder %s1055_s0, %s639_s6 }
  0x19   : > { %p646_p4 = scmp.lt.u32.totalorder %s639_s6, %s1055_s0 }
  0x1a   : > { %p641_p9 = pneg %p887_p5 }
  0x1c   : > { %p642_p11 = pnand %p641_p9, %p640_p7 }
  0x1e   : > { %p643_p13 = pneg %p642_p11 }
  0x20   : > { %p648_p1 = pnand %p646_p4, %p643_p13 }
  0x22   : > { %651 = shalt.err (!%p648_p1)
}
  0x23   : > { %s652_s11 = scalar_lea.vmem %s879_s27, 256  ;;  %p660_p6 = scmp.lt.s32.totalorder %s879_s27, %s879_s27 }
  0x24   : > { %p653_p0 = scmp.ne.s32.totalorder %s879_s27, %s652_s11  ;;  %p661_p3 = scmp.lt.s32.totalorder %s652_s11, %s652_s11 }
  0x26   : > { %p655_p10 = pnand %p653_p0, %p641_p9  ;;  %p662_p12 = por %p661_p3, %p660_p6 }
  0x28   : > { %p656_p8 = pneg %p655_p10 }
  0x2a   : > { %p663_p2 = pnand %p662_p12, %p656_p8 }
  0x2c   : > { %666 = shalt.err (!%p663_p2)
}
  0x2d   : > { %s1065_s18 = smov 128   ;;  %s787_s19 = smov 8  }
  0x2e   : > { %568 = dma.hbm_to_vmem [thread:$0]  (!%p887_p5), %s1055_s0, 256, %s879_s27, [#allocation4], %s1065_s18, %s1065_s18, %s787_s19  }
  0x2f   : > { %p37_p3 = scmp.ge.s32.totalorder %s35_s30, 2  ;;  %s76_s4 = sadd.s32 1, %s771_s14 }
  0x30   : > { %s186_s5 = sand.u32 1, %s771_s14   ;;  %s515_s8 = sshll.u32 %s779_s16, 7 }
  0x31   : > { %s1088_s30 = smov (%p37_p3, %s35_s30), 0  ;;  %s514_s6 = sshll.u32 %s186_s5, 6 }
  0x32   : > { %s72_s7 = ssub.s32 %s779_s16, %s1088_s30  ;;  %s932_s10 = scalar_lea.hbm %s1056_s1, %s515_s8 }
  0x33   : > { %p74_p6 = scmp.eq.s32.totalorder %s72_s7, 0  ;;  %s190_s27 = scalar_lea.vmem [#allocation6], %s514_s6 }
  0x34   : > { %s199_s11 = sshll.u32 %s190_s27, 4  ;;  %s939_s26 = scalar_lea.sflag [#allocation7], %s186_s5  ;;  %s937_s11 = int_to_ptr.vmem [resolvable:$true] %s199_s11 }
  0x35   : > { %s935_s21 = scalar_select %p74_p6, %s771_s14, %s76_s4  }
  0x36   : > { %s667_s18 = scalar_lea.hbm %s932_s10, 1024  ;;  %p1074_p10 = scmp.ne.s32.totalorder %s1073_s29, 0 }
  0x37   : > { %p668_p8 = scmp.ne.s32.totalorder %s932_s10, %s667_s18  ;;  %s672_s28 = scalar_lea.hbm %s1056_s1, 2048 }
  0x38   : > { %p669_p12 = pneg %p1074_p10  ;;  %p673_p2 = scmp.lt.u32.totalorder %s932_s10, %s1056_s1 }
  0x39   : > { %p674_p7 = scmp.lt.u32.totalorder %s672_s28, %s667_s18  ;;  %p676_p11 = scmp.lt.u32.totalorder %s667_s18, %s932_s10 }
  0x3a   : > { %p670_p0 = pnand %p669_p12, %p668_p8 }
  0x3b   : > { %p675_p9 = por %p674_p7, %p673_p2 }
  0x3c   : > { %p671_p5 = pneg %p670_p0 }
  0x3d   : > { %p677_p13 = por %p676_p11, %p675_p9 }
  0x3f   : > { %p678_p4 = pnand %p677_p13, %p671_p5 }
  0x41   : > { %681 = shalt.err (!%p678_p4)
}
  0x42   : > { %s682_s4 = scalar_lea.vmem %s937_s11, 1024  ;;  %s788_s5 = smov [#allocation6]  }
  0x43   : > { %p683_p1 = scmp.ne.s32.totalorder %s937_s11, %s682_s4  ;;  %s687_s27 = sshll.u32 %s788_s5, 4  ;;  %s688_s27 = int_to_ptr.vmem [resolvable:$false] %s687_s27 }
  0x44   : > { %s689_s7 = scalar_lea.vmem %s688_s27, 2048  ;;  %p690_p8 = scmp.lt.s32.totalorder %s937_s11, %s688_s27 }
  0x45   : > { %p685_p3 = pnand %p683_p1, %p669_p12  ;;  %p691_p0 = scmp.lt.s32.totalorder %s689_s7, %s682_s4 }
  0x47   : > { %p686_p6 = pneg %p685_p3  ;;  %p692_p2 = por %p691_p0, %p690_p8 }
  0x49   : > { %p693_p7 = pnand %p692_p2, %p686_p6 }
  0x4b   : > { %696 = shalt.err (!%p693_p7)
}
  0x4c   : > { %s789_s18 = smov 256   ;;  %s1075_s8 = smov 128  }
  0x4d   : > { %572 = dma.hbm_to_vmem [thread:$0]  (!%p1074_p10), %s932_s10, 1024, %s937_s11, %s939_s26, %s789_s18, %s1075_s8, %s787_s19  }
  0x4e   : > { %p1076_p12 = scmp.ne.s32.totalorder %s1071_s25, 0 }
  0x4f   : > { %p1077_p5 = scmp.ne.s32.totalorder (!%p1076_p12), %s1066_s20, 0 }
  0x50   : > { %217 = sbr.rel (%p1076_p12) target bundleno = 366 (0x16e), region = 32 }
  0x57   : > { %750 = dma.done.wait (%p1077_p5), [#allocation4], 256  }
  0x58   : > { %752 = vsyncadd (%p1077_p5), [#allocation4], 4294967040  ;;  %s976_s28 = sand.u32 1, %s767_s13   ;;  %p1078_p10 = scmp.ne.s32.totalorder %s1068_s22, 0 }
  0x59   : > { %s518_s29 = sshll.u32 %s976_s28, 6  ;;  %s224_s6 = scalar_lea.sflag [#allocation7], %s976_s28 }
  0x5a   : > { %s980_s9 = scalar_lea.vmem [#allocation6], %s518_s29 }
  0x5b   : > { %754 = dma.done.wait (%p1078_p10), %s224_s6, 1024  }
  0x5c   : > { %756 = vsyncadd (%p1078_p10), %s224_s6, 4294966272  ;;  %v271_v0 = vld [vmem:[%s980_s9 + $0x20] sm:$0xff]  ;;  %v272_v5 = vld [vmem:[%s980_s9 + $0x28] sm:$0xff]  ;;  %p256_p9 = scmp.lt.s32.totalorder %s775_s15, 1  ;;  %v357_v26 = vlaneseq  ;;  %s519_s10 = sshll.u32 %s976_s28, 3 }
  0x5d   : > { %v267_v1 = vld [vmem:[%s980_s9] sm:$0xff]  ;;  %v283_v2 = vunpack.c.l.s8.bf16 %v271_v0  ;;  %v284_v3 = vunpack.c.h.s8.bf16 %v271_v0  ;;  %v638_v6 = vld [vmem:[#allocation3 + $0x4] ss:$8 sps:$4 sm:$0xff]   ;;  %v285_v8 = vunpack.c.l.s8.bf16 %v272_v5  ;;  %v268_v9 = vld [vmem:[%s980_s9 + $0x8] sm:$0xff]  ;;  %v286_v11 = vunpack.c.h.s8.bf16 %v272_v5  ;;  %s252_s11 = scalar_lea.vmem [#allocation8], %s519_s10  ;;  %s525_s4 = sshll.u32 %s775_s15, 6 }
  0x5e   : > { %v275_v4 = vunpack.c.l.s8.bf16 %v267_v1  ;;  %v276_v7 = vunpack.c.h.s8.bf16 %v267_v1  ;;  %337 = vmatprep.mubr.bf16.mxu0 %v638_v6  ;;  %v277_v10 = vunpack.c.l.s8.bf16 %v268_v9  ;;  %v273_v12 = vld [vmem:[%s980_s9 + $0x30] sm:$0xff]  ;;  %v278_v13 = vunpack.c.h.s8.bf16 %v268_v9  ;;  %v274_v18 = vld [vmem:[%s980_s9 + $0x38] sm:$0xff]  ;;  %s257_s20 = scalar_select %p256_p9, %s775_s15, 1 }
  0x5f   : > { %535 = vmatprep.subr.bf16.mxu0 %v283_v2  ;;  %v287_v14 = vunpack.c.l.s8.bf16 %v273_v12  ;;  %v269_v15 = vld [vmem:[%s980_s9 + $0x10] sm:$0xff]  ;;  %v288_v17 = vunpack.c.h.s8.bf16 %v273_v12  ;;  %v289_v20 = vunpack.c.l.s8.bf16 %v274_v18  ;;  %v270_v21 = vld [vmem:[%s980_s9 + $0x18] sm:$0xff]  ;;  %v290_v23 = vunpack.c.h.s8.bf16 %v274_v18  ;;  %s395_s26 = sshll.u32 %s252_s11, 4  ;;  %s1006_s7 = scalar_lea.hbm %s1058_s3, %s525_s4  ;;  %s1001_s26 = int_to_ptr.vmem [resolvable:$true] %s395_s26 }
  0x60   : > { %536 = vmatpush3.bf16.msra.mxu0 %v275_v4  ;;  %v279_v16 = vunpack.c.l.s8.bf16 %v269_v15  ;;  %v280_v19 = vunpack.c.h.s8.bf16 %v269_v15  ;;  %v281_v22 = vunpack.c.l.s8.bf16 %v270_v21  ;;  %v282_v24 = vunpack.c.h.s8.bf16 %v270_v21  ;;  %v636_v25 = vld [vmem:[#allocation3] ss:$8 sps:$4 sm:$0xff]   ;;  %s258_s19 = scalar_lea.vmem %s1057_s2, %s257_s20  ;;  %s380_s18 = scalar_lea.sflag [#allocation5], %s976_s28 }
  0x61   : > { %537 = vmatprep.subr.bf16.mxu0 %v284_v3  ;;  %v358_v27 = vshrl.u32 %v357_v26, 7  ;;  %v353_v28 = vld [vmem:[%s258_s19] sm:$0x1]  ;;  %s697_s8 = scalar_lea.vmem %s1001_s26, 128  ;;  %p1079_p13 = scmp.ne.s32.totalorder %s1069_s23, 0 }
  0x62   : > { %v354_v29 = vunpack.c.l.bf16 %v353_v28  ;;  %p698_p11 = scmp.ne.s32.totalorder %s1001_s26, %s697_s8  ;;  %s790_s15 = smov [#allocation8]  }
  0x63   : > { %v359_v30 = vsub.s32 0, %v358_v27  ;;  %v365_v33 = vsub.s32 1, %v358_v27  ;;  %s701_s29 = sshll.u32 %s790_s15, 4  ;;  %s702_s29 = int_to_ptr.vmem [resolvable:$false] %s701_s29 }
  0x64   : > { %538 = vmatpush3.bf16.msra.mxu0 %v276_v7  ;;  %p699_p4 = pnand %p698_p11, %p1079_p13  ;;  %s703_s6 = scalar_lea.vmem %s702_s29, 256 }
  0x65   : > { %539 = vmatprep.subr.bf16.mxu0 %v285_v8  ;;  %v360_v32 = vrot.slane %v354_v29, %v359_v30  ;;  %v366_v39 = vrot.slane %v354_v29, %v365_v33  ;;  %p704_p3 = scmp.lt.s32.totalorder %s1001_s26, %s702_s29  ;;  %p705_p6 = scmp.lt.s32.totalorder %s703_s6, %s697_s8 }
  0x66   : > { %p700_p1 = pneg %p699_p4 }
  0x67   : > { %p706_p8 = por %p705_p6, %p704_p3 }
  0x68   : > { %540 = vmatpush3.bf16.msra.mxu0 %v277_v10 }
  0x69   : > { %541 = vmatprep.subr.bf16.mxu0 %v286_v11  ;;  %p707_p0 = pnand %p706_p8, %p700_p1 }
  0x6c   : > { %542 = vmatpush3.bf16.msra.mxu0 %v278_v13 }
  0x6d   : > { %543 = vmatprep.subr.bf16.mxu0 %v287_v14 }
  0x70   : > { %544 = vmatpush3.bf16.msra.mxu0 %v279_v16 }
  0x71   : > { %545 = vmatprep.subr.bf16.mxu0 %v288_v17 }
  0x74   : > { %546 = vmatpush3.bf16.msra.mxu0 %v280_v19 }
  0x75   : > { %547 = vmatprep.subr.bf16.mxu0 %v289_v20 }
  0x78   : > { %548 = vmatpush3.bf16.msra.mxu0 %v281_v22 }
  0x79   : > { %549 = vmatprep.subr.bf16.mxu0 %v290_v23 }
  0x7c   : > { %550 = vmatpush3.bf16.msra.mxu0 %v282_v24 }
  0x7f   : > { %338 = vmatmul.mubr.bf16.vlgmr.msra.gmra.mrb[0].mxu0 %v636_v25 }
 0x152   : > { %v551_v31 = vpop.f32.mrb[0].mxu0 }
 0x153   : > { %v552_v34 = vpop.f32.mrb[1].mxu0 }
 0x154   : > { %v553_v35 = vadd.f32 %v552_v34, %v551_v31  ;;  %v554_v36 = vpop.f32.mrb[2].mxu0 }
 0x155   : > { %v555_v37 = vpop.f32.mrb[3].mxu0 }
 0x156   : > { %v361_v38 = vmul.f32 %v553_v35, %v360_v32  ;;  %v556_v40 = vadd.f32 %v555_v37, %v554_v36 }
 0x158   : > { %v362_v41 = vmul.f32 %v556_v40, %v360_v32  ;;  %v367_v42 = vadd.f32 %v366_v39, %v361_v38 }
 0x15a   : > { %v368_v43 = vadd.f32 %v366_v39, %v362_v41 }
 0x15c   : > { %v533_v44 = vpack.c.bf16 %v368_v43, %v367_v42 }
 0x15e   : > { %534 = vst [vmem:[%s252_s11] sm:$0xff] %v533_v44  }
 0x15f   : > { %710 = shalt.err (!%p707_p0)
}
 0x160   : > { %s711_s9 = scalar_lea.hbm %s1006_s7, 128  ;;  %s715_s25 = scalar_lea.hbm %s1058_s3, 256 }
 0x161   : > { %p712_p2 = scmp.ne.s32.totalorder %s1006_s7, %s711_s9  ;;  %p716_p5 = scmp.lt.u32.totalorder %s1006_s7, %s1058_s3 }
 0x162   : > { %p717_p10 = scmp.lt.u32.totalorder %s715_s25, %s711_s9  ;;  %p719_p11 = scmp.lt.u32.totalorder %s711_s9, %s1006_s7 }
 0x163   : > { %p713_p7 = pnand %p712_p2, %p1079_p13 }
 0x164   : > { %p718_p9 = por %p717_p10, %p716_p5 }
 0x165   : > { %p714_p12 = pneg %p713_p7 }
 0x166   : > { %p720_p4 = por %p719_p11, %p718_p9 }
 0x168   : > { %p721_p1 = pnand %p720_p4, %p714_p12 }
 0x16a   : > { %724 = shalt.err (!%p721_p1)
}
 0x16b   : > { %s791_s11 = smov 64   ;;  %s792_s4 = smov 128  }
 0x16c   : > { %s793_s5 = smov 4  }
 0x16d   : > { %563 = dma.vmem_to_hbm [thread:$0]  (%p1079_p13), %s1001_s26, 128, %s1006_s7, %s380_s18, %s791_s11, %s792_s4, %s793_s5  }
 0x16e PF: > { %s410_s27 = sand.u32 1, %s763_s12   ;;  %p1080_p3 = scmp.ne.s32.totalorder %s1070_s24, 0 }
 0x16f   : > { %p1081_p6 = scmp.ge.s32.totalorder %s783_s17, 2  ;;  %s411_s8 = scalar_lea.sflag [#allocation5], %s410_s27 }
 0x171   : > { %p574_p8 = pnand %p1081_p6, %p1080_p3 }
 0x173   : > { %758 = dma.done.wait (!%p574_p8), %s411_s8, 128  }
 0x174   : > { %760 = vsyncadd (!%p574_p8), %s411_s8, 4294967168  ;;  %s20_s17 = sadd.s32 1, %s783_s17   ;;  %s1082_s12 = smov %s767_s13 }
 0x175   : > { %p17_p0 = scmp.ge.s32.totalorder %s20_s17, 4   ;;  %s1083_s13 = smov %s771_s14 }
 0x176   : > { %s1084_s14 = smov %s935_s21  ;;  %s1085_s15 = smov %s779_s16 }
 0x177   : > { %s1086_s16 = smov %s1088_s30  ;;  %19 = sbr.rel (!%p17_p0) target bundleno = 7 (0x7), region = 94 }
 0x17e   :  { %416 = vsyncpa [#allocation4], 1 }
 0x17f   :  { %418 = vsyncpa [#allocation4 + $0x1], 1 }
 0x180   :  { %419 = vsyncpa [#allocation7], 1 }
 0x181   :  { %421 = vsyncpa [#allocation7 + $0x1], 1 }
 0x182   :  { %422 = vsyncpa [#allocation5], 1 }
 0x183   :  { %424 = vsyncpa [#allocation5 + $0x1], 1 }

</bundles_post_ra>
